<compile_context>
chip_gen: v5e
topology: v5e:2x2
jax: 0.10.0
libtpu: 0.0.40
codegen_flags: <defaults>
</compile_context>

<pallas_src>
import functools

import jax
import jax.numpy as jnp
from jax.experimental import pallas as pl
from jax.experimental.pallas import tpu as pltpu

LANES = 128  # pad the output feature dim to a full lane width (unmasked vst)


def _round_up(x, m):
    return ((x + m - 1) // m) * m


def _cdiv(a, b):
    return (a + b - 1) // b


def qnetwork_kernel(obs_ref, w1_ref, b1_ref, w2_ref, b2_ref, w3_ref, b3_ref, out_ref):
    # obs arrives f32; cast to bf16 in-kernel (cheap VPU op, hidden under MXU).
    # All matmuls accumulate in f32 on the MXU; bias-add / ReLU stay f32.
    x = obs_ref[...].astype(jnp.bfloat16)

    h1 = jnp.dot(x, w1_ref[...], preferred_element_type=jnp.float32) + b1_ref[...]
    h1 = jnp.maximum(h1, 0.0)

    h2 = jnp.dot(h1.astype(jnp.bfloat16), w2_ref[...],
                 preferred_element_type=jnp.float32) + b2_ref[...]
    h2 = jnp.maximum(h2, 0.0)

    q = jnp.dot(h2.astype(jnp.bfloat16), w3_ref[...],
                preferred_element_type=jnp.float32) + b3_ref[...]
    out_ref[...] = q.astype(out_ref.dtype)


def _resident_spec(shape):
    """Grid-invariant VMEM-resident block; single-buffered when supported."""
    index_map = lambda i: (0, 0)
    try:
        return pl.BlockSpec(shape, index_map, pipeline_mode=pl.Buffered(1))
    except TypeError:  # older jax without pipeline_mode kwarg
        return pl.BlockSpec(shape, index_map)


def prepare_qnetwork_params(params):
    """One-time conversion of f32 (in,out)-layout params into kernel-ready form:
    bf16 weights, f32 biases, final layer zero-padded out to 128 columns."""
    w1, b1 = params["w1"], params["b1"]
    w2, b2 = params["w2"], params["b2"]
    w3, b3 = params["w3"], params["b3"]
    n_actions = w3.shape[1]
    out_pad = _round_up(max(n_actions, 1), LANES)
    w3p = jnp.pad(w3, ((0, 0), (0, out_pad - n_actions)))
    b3p = jnp.pad(b3, ((0, 0), (0, out_pad - n_actions)))
    return {
        "w1": w1.astype(jnp.bfloat16), "b1": b1.astype(jnp.float32),
        "w2": w2.astype(jnp.bfloat16), "b2": b2.astype(jnp.float32),
        "w3": w3p.astype(jnp.bfloat16), "b3": b3p.astype(jnp.float32),
        "n_actions": int(n_actions),
    }


@functools.partial(jax.jit, static_argnames=("batch_tile", "out_dtype"))
def _qnetwork_pallas(obs, w1, b1, w2, b2, w3, b3, *, batch_tile, out_dtype):
    batch, obs_dim = obs.shape
    hidden = w1.shape[1]
    out_pad = w3.shape[1]

    # --- batch tiling: multiple of 16, >=2 grid steps when possible, minimal pad.
    batch16 = _round_up(batch, 16)
    min_tiles = 2 if batch16 >= 32 else 1          # feed both TCs on v7x
    n_tiles = max(_cdiv(batch16, batch_tile), min_tiles)
    tb = _round_up(_cdiv(batch16, n_tiles), 16)
    padded_batch = tb * n_tiles
    if padded_batch != batch:
        obs = jnp.pad(obs, ((0, padded_batch - batch), (0, 0)))

    grid = (n_tiles,)

    flops = 2 * padded_batch * (obs_dim * hidden + hidden * hidden + hidden * out_pad)
    out_bytes = padded_batch * out_pad * jnp.dtype(out_dtype).itemsize
    bytes_accessed = (
        obs.size * 4
        + (w1.size + w2.size + w3.size) * 2
        + (b1.size + b2.size + b3.size) * 4
        + out_bytes
    )

    out_padded = pl.pallas_call(
        qnetwork_kernel,
        out_shape=jax.ShapeDtypeStruct((padded_batch, out_pad), out_dtype),
        grid=grid,
        in_specs=[
            pl.BlockSpec((tb, obs_dim), lambda i: (i, 0)),  # obs streamed per tile
            _resident_spec(w1.shape), _resident_spec(b1.shape),
            _resident_spec(w2.shape), _resident_spec(b2.shape),
            _resident_spec(w3.shape), _resident_spec(b3.shape),
        ],
        out_specs=pl.BlockSpec((tb, out_pad), lambda i: (i, 0)),
        compiler_params=pltpu.CompilerParams(
            dimension_semantics=("parallel",),
        ),
        cost_estimate=pl.CostEstimate(
            flops=flops, transcendentals=0, bytes_accessed=bytes_accessed
        ),
    )(obs, w1, b1, w2, b2, w3, b3)

    return out_padded


def qnetwork_forward(obs, prepared, *, batch_tile=512, out_dtype=jnp.float32):
    """obs: (batch, obs_dim) f32; prepared: output of prepare_qnetwork_params."""
    batch = obs.shape[0]
    n_actions = prepared["n_actions"]
    out_padded = _qnetwork_pallas(
        obs,
        prepared["w1"], prepared["b1"],
        prepared["w2"], prepared["b2"],
        prepared["w3"], prepared["b3"],
        batch_tile=batch_tile, out_dtype=out_dtype,
    )
    # TODO(synk): fuse the consumer (e.g. argmax over the first n_actions) into
    # the kernel when possible to avoid this extra pass over the padded output.
    return out_padded[:batch, :n_actions]


def init_params(key, obs_dim, n_actions, hidden_dim):
    """Deterministic init mimicking PyTorch's U(-1/sqrt(fan_in), 1/sqrt(fan_in))."""
    ks = jax.random.split(key, 6)

    def lin(kw, kb, fan_in, fan_out):
        bound = 1.0 / jnp.sqrt(jnp.float32(fan_in))
        w = jax.random.uniform(kw, (fan_in, fan_out), jnp.float32, -bound, bound)
        b = jax.random.uniform(kb, (1, fan_out), jnp.float32, -bound, bound)
        return w, b

    w1, b1 = lin(ks[0], ks[1], obs_dim, hidden_dim)
    w2, b2 = lin(ks[2], ks[3], hidden_dim, hidden_dim)
    w3, b3 = lin(ks[4], ks[5], hidden_dim, n_actions)
    return {"w1": w1, "b1": b1, "w2": w2, "b2": b2, "w3": w3, "b3": b3}


if __name__ == "__main__":
    batch, obs_dim, n_actions, hidden_dim = 8, 16, 8, 256  # hidden_dim = module default

    key = jax.random.PRNGKey(0)
    k_obs, k_params = jax.random.split(key)
    obs = jax.random.normal(k_obs, (batch, obs_dim), jnp.float32)
    params = init_params(k_params, obs_dim, n_actions, hidden_dim)
    prepared = prepare_qnetwork_params(params)   # one-time bf16 cast + padding

    q_vals = jax.block_until_ready(qnetwork_forward(obs, prepared))
    assert q_vals.shape == (batch, n_actions)
    assert q_vals.dtype == jnp.float32

    # Pure-JAX reference with the same bf16 operand casts / f32 accumulation.
    bf = jnp.bfloat16
    h1 = jnp.maximum(
        jnp.dot(obs.astype(bf), params["w1"].astype(bf),
                preferred_element_type=jnp.float32) + params["b1"], 0.0)
    h2 = jnp.maximum(
        jnp.dot(h1.astype(bf), params["w2"].astype(bf),
                preferred_element_type=jnp.float32) + params["b2"], 0.0)
    ref = jnp.dot(h2.astype(bf), params["w3"].astype(bf),
                  preferred_element_type=jnp.float32) + params["b3"]

    assert jnp.allclose(q_vals, ref, atol=1e-3, rtol=1e-3)

    # Sanity check against full-f32 math (loose, bf16 operand rounding).
    ref_f32 = jnp.maximum(obs @ params["w1"] + params["b1"], 0.0)
    ref_f32 = jnp.maximum(ref_f32 @ params["w2"] + params["b2"], 0.0)
    ref_f32 = ref_f32 @ params["w3"] + params["b3"]
    assert jnp.allclose(q_vals, ref_f32, atol=5e-2, rtol=5e-2)

    # Exercise the bf16-output path (recommended for HBM-write-bound v5e/v6e).
    q_bf16 = jax.block_until_ready(
        qnetwork_forward(obs, prepared, out_dtype=jnp.bfloat16))
    assert q_bf16.shape == (batch, n_actions) and q_bf16.dtype == jnp.bfloat16
    assert jnp.allclose(q_bf16.astype(jnp.float32), ref, atol=5e-2, rtol=5e-2)

    print("KERNEL_OK")
</pallas_src>

<mosaic_0001>
module attributes {stable_mosaic.version = 11 : i64} {
  func.func @qnetwork_kernel(%arg0: i32, %arg1: memref<16x16xf32, #tpu.memory_space<vmem>>, %arg2: memref<16x256xbf16, #tpu.memory_space<vmem>>, %arg3: memref<1x256xf32, #tpu.memory_space<vmem>>, %arg4: memref<256x256xbf16, #tpu.memory_space<vmem>>, %arg5: memref<1x256xf32, #tpu.memory_space<vmem>>, %arg6: memref<256x128xbf16, #tpu.memory_space<vmem>>, %arg7: memref<1x128xf32, #tpu.memory_space<vmem>>, %arg8: memref<16x128xf32, #tpu.memory_space<vmem>>) attributes {dimension_semantics = [#tpu.dimension_semantics<parallel>], iteration_bounds = array<i64: 1>, scalar_prefetch = 0 : i64, scratch_operands = 0 : i64, tpu.core_type = #tpu.core_type<tc>, window_params = [{transform_indices = @transform_0, window_bounds = array<i64: 16, 16>}, {pipeline_mode = #tpu.pipeline_mode<synchronous>, transform_indices = @transform_1, window_bounds = array<i64: 16, 256>}, {pipeline_mode = #tpu.pipeline_mode<synchronous>, transform_indices = @transform_2, window_bounds = array<i64: 1, 256>}, {pipeline_mode = #tpu.pipeline_mode<synchronous>, transform_indices = @transform_3, window_bounds = array<i64: 256, 256>}, {pipeline_mode = #tpu.pipeline_mode<synchronous>, transform_indices = @transform_4, window_bounds = array<i64: 1, 256>}, {pipeline_mode = #tpu.pipeline_mode<synchronous>, transform_indices = @transform_5, window_bounds = array<i64: 256, 128>}, {pipeline_mode = #tpu.pipeline_mode<synchronous>, transform_indices = @transform_6, window_bounds = array<i64: 1, 128>}, {transform_indices = @transform_7, window_bounds = array<i64: 16, 128>}]} {
    %c0 = arith.constant 0 : index
    %c0_0 = arith.constant 0 : index
    %0 = vector.load %arg1[%c0, %c0_0] : memref<16x16xf32, #tpu.memory_space<vmem>>, vector<16x16xf32>
    %1 = arith.truncf %0 : vector<16x16xf32> to vector<16x16xbf16>
    %c0_1 = arith.constant 0 : index
    %c0_2 = arith.constant 0 : index
    %2 = vector.load %arg2[%c0_1, %c0_2] : memref<16x256xbf16, #tpu.memory_space<vmem>>, vector<16x256xbf16>
    %cst = arith.constant dense<0.000000e+00> : vector<16x256xf32>
    %3 = tpu.matmul %1, %2, %cst {dimension_numbers = #tpu.dot_dimension_numbers<[1], [0], [0], [1], [0, 0, 1, 1], [], []>} : vector<16x16xbf16>, vector<16x256xbf16>, vector<16x256xf32> -> vector<16x256xf32>
    %c0_3 = arith.constant 0 : index
    %c0_4 = arith.constant 0 : index
    %4 = vector.load %arg3[%c0_3, %c0_4] : memref<1x256xf32, #tpu.memory_space<vmem>>, vector<1x256xf32>
    %5 = vector.broadcast %4 : vector<1x256xf32> to vector<16x256xf32>
    %6 = arith.addf %3, %5 : vector<16x256xf32>
    %cst_5 = arith.constant 0.000000e+00 : f32
    %7 = vector.broadcast %cst_5 : f32 to vector<16x256xf32>
    %8 = arith.maximumf %6, %7 : vector<16x256xf32>
    %9 = arith.truncf %8 : vector<16x256xf32> to vector<16x256xbf16>
    %c0_6 = arith.constant 0 : index
    %c0_7 = arith.constant 0 : index
    %10 = vector.load %arg4[%c0_6, %c0_7] : memref<256x256xbf16, #tpu.memory_space<vmem>>, vector<256x256xbf16>
    %cst_8 = arith.constant dense<0.000000e+00> : vector<16x256xf32>
    %11 = tpu.matmul %9, %10, %cst_8 {dimension_numbers = #tpu.dot_dimension_numbers<[1], [0], [0], [1], [0, 0, 1, 1], [], []>} : vector<16x256xbf16>, vector<256x256xbf16>, vector<16x256xf32> -> vector<16x256xf32>
    %c0_9 = arith.constant 0 : index
    %c0_10 = arith.constant 0 : index
    %12 = vector.load %arg5[%c0_9, %c0_10] : memref<1x256xf32, #tpu.memory_space<vmem>>, vector<1x256xf32>
    %13 = vector.broadcast %12 : vector<1x256xf32> to vector<16x256xf32>
    %14 = arith.addf %11, %13 : vector<16x256xf32>
    %cst_11 = arith.constant 0.000000e+00 : f32
    %15 = vector.broadcast %cst_11 : f32 to vector<16x256xf32>
    %16 = arith.maximumf %14, %15 : vector<16x256xf32>
    %17 = arith.truncf %16 : vector<16x256xf32> to vector<16x256xbf16>
    %c0_12 = arith.constant 0 : index
    %c0_13 = arith.constant 0 : index
    %18 = vector.load %arg6[%c0_12, %c0_13] : memref<256x128xbf16, #tpu.memory_space<vmem>>, vector<256x128xbf16>
    %cst_14 = arith.constant dense<0.000000e+00> : vector<16x128xf32>
    %19 = tpu.matmul %17, %18, %cst_14 {dimension_numbers = #tpu.dot_dimension_numbers<[1], [0], [0], [1], [0, 0, 1, 1], [], []>} : vector<16x256xbf16>, vector<256x128xbf16>, vector<16x128xf32> -> vector<16x128xf32>
    %c0_15 = arith.constant 0 : index
    %c0_16 = arith.constant 0 : index
    %20 = vector.load %arg7[%c0_15, %c0_16] : memref<1x128xf32, #tpu.memory_space<vmem>>, vector<1x128xf32>
    %21 = vector.broadcast %20 : vector<1x128xf32> to vector<16x128xf32>
    %22 = arith.addf %19, %21 : vector<16x128xf32>
    %c0_17 = arith.constant 0 : index
    %c0_18 = arith.constant 0 : index
    %23 = vector.load %arg8[%c0_17, %c0_18] : memref<16x128xf32, #tpu.memory_space<vmem>>, vector<16x128xf32>
    tpu.vector_store %arg8[%c0_17, %c0_18], %22 {strides = array<i32>} : memref<16x128xf32, #tpu.memory_space<vmem>>, vector<16x128xf32>,
    return
  }
  func.func @transform_0(%arg0: i32) -> (i32, i32) {
    %c0_i32 = arith.constant 0 : i32
    %c0_i32_0 = arith.constant 0 : i32
    return %arg0, %c0_i32 : i32, i32
  }
  func.func @transform_1(%arg0: i32) -> (i32, i32) {
    %c0_i32 = arith.constant 0 : i32
    %c0_i32_0 = arith.constant 0 : i32
    %c0_i32_1 = arith.constant 0 : i32
    return %c0_i32, %c0_i32_0 : i32, i32
  }
  func.func @transform_2(%arg0: i32) -> (i32, i32) {
    %c0_i32 = arith.constant 0 : i32
    %c0_i32_0 = arith.constant 0 : i32
    %c0_i32_1 = arith.constant 0 : i32
    return %c0_i32, %c0_i32_0 : i32, i32
  }
  func.func @transform_3(%arg0: i32) -> (i32, i32) {
    %c0_i32 = arith.constant 0 : i32
    %c0_i32_0 = arith.constant 0 : i32
    %c0_i32_1 = arith.constant 0 : i32
    return %c0_i32, %c0_i32_0 : i32, i32
  }
  func.func @transform_4(%arg0: i32) -> (i32, i32) {
    %c0_i32 = arith.constant 0 : i32
    %c0_i32_0 = arith.constant 0 : i32
    %c0_i32_1 = arith.constant 0 : i32
    return %c0_i32, %c0_i32_0 : i32, i32
  }
  func.func @transform_5(%arg0: i32) -> (i32, i32) {
    %c0_i32 = arith.constant 0 : i32
    %c0_i32_0 = arith.constant 0 : i32
    %c0_i32_1 = arith.constant 0 : i32
    return %c0_i32, %c0_i32_0 : i32, i32
  }
  func.func @transform_6(%arg0: i32) -> (i32, i32) {
    %c0_i32 = arith.constant 0 : i32
    %c0_i32_0 = arith.constant 0 : i32
    %c0_i32_1 = arith.constant 0 : i32
    return %c0_i32, %c0_i32_0 : i32, i32
  }
  func.func @transform_7(%arg0: i32) -> (i32, i32) {
    %c0_i32 = arith.constant 0 : i32
    %c0_i32_0 = arith.constant 0 : i32
    return %arg0, %c0_i32 : i32, i32
  }
}

</mosaic_0001>

<bundles_post_ra>
// kernel: _qnetwork_pallas.1
= control target key start
LH: loop header
LB: loop body
LE: loop exit
PB: predicated region body
PF: predicated region fallthrough
CT: control target
= control target key end

     0   :  { %12 = vsyncpa [#allocation3], 0  ;;  %s990_s0 = inlined_call_operand.vmem [shape: f32[16,16], index: 0, kind: input, shape index: {}]   ;;  %s991_s1 = inlined_call_operand.vmem [shape: bf16[16,256], index: 1, kind: input, shape index: {}]   ;;  %s992_s2 = inlined_call_operand.vmem [shape: f32[1,256], index: 2, kind: input, shape index: {}]   ;;  %s993_s3 = inlined_call_operand.hbm [shape: bf16[256,256], index: 3, kind: input, shape index: {}]   ;;  %s994_s4 = inlined_call_operand.vmem [shape: f32[1,256], index: 4, kind: input, shape index: {}]   ;;  %s995_s5 = inlined_call_operand.hbm [shape: bf16[256,128], index: 5, kind: input, shape index: {}]   ;;  %s996_s6 = inlined_call_operand.vmem [shape: f32[1,128], index: 6, kind: input, shape index: {}]   ;;  %s997_s7 = inlined_call_operand.hbm [shape: f32[16,128], index: 7, kind: output, shape index: {}]  }
   0x1   :  { %13 = vsyncpa [#allocation6], 0 }
   0x2   :  { %14 = vsyncpa [#allocation4], 0  ;;  %s25_s26 = sshll.u32 %s993_s3, 4  ;;  %s899_s27 = smov [#allocation2]   ;;  %s26_s26 = int_to_ptr.hbm [resolvable:$true] %s25_s26 }
   0x3   :  { %s27_s28 = sshll.u32 %s899_s27, 4  ;;  %s40_s8 = sshll.u32 %s995_s5, 4  ;;  %s28_s28 = int_to_ptr.vmem [resolvable:$true] %s27_s28  ;;  %s41_s8 = int_to_ptr.hbm [resolvable:$true] %s40_s8 }
   0x4   :  { %s900_s9 = smov 128   ;;  %s901_s10 = smov 8  }
   0x5   :  { %33 = dma.hbm_to_vmem [thread:$0]  %s26_s26, 4096, %s28_s28, [#allocation3], %s900_s9, %s900_s9, %s901_s10  }
   0x6   :  { %s902_s11 = smov [#allocation5]   ;;  %s903_s13 = smov 64  }
   0x7   :  { %s42_s12 = sshll.u32 %s902_s11, 4  ;;  %s904_s3 = smov 4   ;;  %s43_s12 = int_to_ptr.vmem [resolvable:$true] %s42_s12 }
   0x8   :  { %48 = dma.hbm_to_vmem [thread:$0]  %s41_s8, 2048, %s43_s12, [#allocation6], %s903_s13, %s903_s13, %s904_s3  }
   0x9   :  { %893 = dma.done.wait [#allocation3], 4096  }
   0xa   :  { %894 = vsyncadd [#allocation3], 4294963200 }
   0xb   :  { %895 = dma.done.wait [#allocation6], 2048  }
   0xc   :  { %896 = vsyncadd [#allocation6], 4294965248  ;;  %v563_v0 = vld [vmem:[%s991_s1] sm:$0xf]  ;;  %v764_v1 = vld [vmem:[%s991_s1 + $0x4] sm:$0xf0] }
   0xd   :  { %v763_v2 = vld [vmem:[%s991_s1 + $0x4] sm:$0xf]  ;;  %v564_v3 = vor.u32 %v764_v1, %v563_v0  ;;  %v565_v4 = vld [vmem:[%s991_s1 + $0x8] sm:$0xf0]  ;;  %vm81_vm0 = vcmask 130048   ;;  %s905_s27 = smov [#allocation7]  }
   0xe   :  { %v60_v5 = vld [vmem:[%s990_s0] sm:$0xff]  ;;  %v61_v6 = vld [vmem:[%s990_s0 + $0x8] sm:$0xff]  ;;  %v568_v7 = vor.u32 %v763_v2, %v565_v4  ;;  %v629_v9 = vld [vmem:[#allocation2 + $0x70] sm:$0xf]  ;;  %s545_s28 = sshll.u32 %s905_s27, 4  ;;  %s547_s8 = sshll.u32 %s997_s7, 4  ;;  %s546_s28 = int_to_ptr.vmem [resolvable:$true] %s545_s28  ;;  %s548_s8 = int_to_ptr.hbm [resolvable:$true] %s547_s8 }
   0xf   :  { %v62_v8 = vpack.c.bf16 %v61_v6, %v60_v5  ;;  %v780_v10 = vld [vmem:[#allocation2 + $0x74] sm:$0xf0]  ;;  %v693_v11 = vld [vmem:[#allocation2 + $0xf0] sm:$0xf]  ;;  %92 = vmatpush.bf16.msra.mxu0 %v564_v3  ;;  %v779_v14 = vld [vmem:[#allocation2 + $0x74] sm:$0xf] }
  0x10   :  { %v630_v12 = vor.u32 %v780_v10, %v629_v9  ;;  %v796_v13 = vld [vmem:[#allocation2 + $0xf4] sm:$0xf0]  ;;  %v631_v15 = vld [vmem:[#allocation2 + $0x78] sm:$0xf0]  ;;  %106 = vmatpush.bf16.msra.mxu1 %v568_v7  ;;  %v795_v18 = vld [vmem:[#allocation2 + $0xf4] sm:$0xf] }
  0x11   :  { %v694_v16 = vor.u32 %v796_v13, %v693_v11  ;;  %v634_v17 = vor.u32 %v779_v14, %v631_v15  ;;  %v695_v19 = vld [vmem:[#allocation2 + $0xf8] sm:$0xf0]  ;;  %v621_v20 = vld [vmem:[#allocation2 + $0x60] sm:$0xf]  ;;  %v778_v22 = vld [vmem:[#allocation2 + $0x64] sm:$0xf0] }
  0x12   :  { %317 = vmatpush.bf16.msra.mxu2 %v630_v12  ;;  %v698_v21 = vor.u32 %v795_v18, %v695_v19  ;;  %v685_v23 = vld [vmem:[#allocation2 + $0xe0] sm:$0xf]  ;;  %v794_v24 = vld [vmem:[#allocation2 + $0xe4] sm:$0xf0]  ;;  %569 = vmatmul.msk.bf16.vlgmr.msra.gmra.mxu0 %vm81_vm0, %v62_v8  ;;  %v622_v25 = vor.u32 %v778_v22, %v621_v20  ;;  %v777_v27 = vld [vmem:[#allocation2 + $0x64] sm:$0xf] }
  0x13   :  { %331 = vmatpush.bf16.msra.mxu3 %v694_v16  ;;  %v686_v26 = vor.u32 %v794_v24, %v685_v23  ;;  %v623_v28 = vld [vmem:[#allocation2 + $0x68] sm:$0xf0]  ;;  %v793_v29 = vld [vmem:[#allocation2 + $0xe4] sm:$0xf]  ;;  %570 = vmatmul.msk.bf16.vlgmr.msra.gmra.mxu1 %vm81_vm0, %v62_v8  ;;  %v613_v32 = vld [vmem:[#allocation2 + $0x50] sm:$0xf] }
  0x14   :  { %345 = vmatpush.bf16.msrb.mxu0 %v634_v17  ;;  %v626_v30 = vor.u32 %v777_v27, %v623_v28  ;;  %v687_v31 = vld [vmem:[#allocation2 + $0xe8] sm:$0xf0]  ;;  %v776_v33 = vld [vmem:[#allocation2 + $0x54] sm:$0xf0]  ;;  %359 = vmatpush.bf16.msrb.mxu1 %v698_v21  ;;  %v677_v35 = vld [vmem:[#allocation2 + $0xd0] sm:$0xf] }
  0x15   :  { %v690_v34 = vor.u32 %v793_v29, %v687_v31  ;;  %v792_v36 = vld [vmem:[#allocation2 + $0xd4] sm:$0xf0]  ;;  %v775_v37 = vld [vmem:[#allocation2 + $0x54] sm:$0xf]  ;;  %v614_v38 = vor.u32 %v776_v33, %v613_v32  ;;  %v615_v39 = vld [vmem:[#allocation2 + $0x58] sm:$0xf0] }
  0x16   :  { %318 = vmatpush.bf16.msra.mxu2 %v622_v25  ;;  %v791_v40 = vld [vmem:[#allocation2 + $0xd4] sm:$0xf]  ;;  %v679_v41 = vld [vmem:[#allocation2 + $0xd8] sm:$0xf0]  ;;  %v678_v42 = vor.u32 %v792_v36, %v677_v35  ;;  %v605_v43 = vld [vmem:[#allocation2 + $0x40] sm:$0xf]  ;;  %v618_v45 = vor.u32 %v775_v37, %v615_v39 }
  0x17   :  { %332 = vmatpush.bf16.msra.mxu3 %v686_v26  ;;  %v774_v44 = vld [vmem:[#allocation2 + $0x44] sm:$0xf0]  ;;  %v669_v46 = vld [vmem:[#allocation2 + $0xc0] sm:$0xf]  ;;  %v682_v48 = vor.u32 %v791_v40, %v679_v41  ;;  %v773_v49 = vld [vmem:[#allocation2 + $0x44] sm:$0xf] }
  0x18   :  { %346 = vmatpush.bf16.msrb.mxu0 %v626_v30  ;;  %v790_v47 = vld [vmem:[#allocation2 + $0xc4] sm:$0xf0]  ;;  %360 = vmatpush.bf16.msrb.mxu1 %v690_v34  ;;  %v607_v50 = vld [vmem:[#allocation2 + $0x48] sm:$0xf0]  ;;  %v606_v51 = vor.u32 %v774_v44, %v605_v43  ;;  %v789_v52 = vld [vmem:[#allocation2 + $0xc4] sm:$0xf] }
  0x19   :  { %v671_v53 = vld [vmem:[#allocation2 + $0xc8] sm:$0xf0]  ;;  %v670_v54 = vor.u32 %v790_v47, %v669_v46  ;;  %v610_v55 = vor.u32 %v773_v49, %v607_v50  ;;  %v597_v57 = vld [vmem:[#allocation2 + $0x30] sm:$0xf]  ;;  %v772_v58 = vld [vmem:[#allocation2 + $0x34] sm:$0xf0] }
  0x1a   :  { %319 = vmatpush.bf16.msra.mxu2 %v614_v38  ;;  %v674_v56 = vor.u32 %v789_v52, %v671_v53  ;;  %v661_v59 = vld [vmem:[#allocation2 + $0xb0] sm:$0xf]  ;;  %v598_v60 = vor.u32 %v772_v58, %v597_v57  ;;  %v788_v61 = vld [vmem:[#allocation2 + $0xb4] sm:$0xf0]  ;;  %v771_v62 = vld [vmem:[#allocation2 + $0x34] sm:$0xf] }
  0x1b   :  { %333 = vmatpush.bf16.msra.mxu3 %v678_v42  ;;  %v599_v63 = vld [vmem:[#allocation2 + $0x38] sm:$0xf0]  ;;  %v662_v0 = vor.u32 %v788_v61, %v661_v59  ;;  %v787_v2 = vld [vmem:[#allocation2 + $0xb4] sm:$0xf]  ;;  %v589_v5 = vld [vmem:[#allocation2 + $0x20] sm:$0xf] }
  0x1c   :  { %347 = vmatpush.bf16.msrb.mxu0 %v618_v45  ;;  %361 = vmatpush.bf16.msrb.mxu1 %v682_v48  ;;  %v602_v1 = vor.u32 %v771_v62, %v599_v63  ;;  %v663_v3 = vld [vmem:[#allocation2 + $0xb8] sm:$0xf0]  ;;  %v770_v6 = vld [vmem:[#allocation2 + $0x24] sm:$0xf0]  ;;  %v653_v8 = vld [vmem:[#allocation2 + $0xa0] sm:$0xf] }
  0x1d   :  { %v666_v4 = vor.u32 %v787_v2, %v663_v3  ;;  %v590_v7 = vor.u32 %v770_v6, %v589_v5  ;;  %v786_v9 = vld [vmem:[#allocation2 + $0xa4] sm:$0xf0]  ;;  %v769_v10 = vld [vmem:[#allocation2 + $0x24] sm:$0xf]  ;;  %v591_v12 = vld [vmem:[#allocation2 + $0x28] sm:$0xf0] }
  0x1e   :  { %320 = vmatpush.bf16.msra.mxu2 %v606_v51  ;;  %v654_v11 = vor.u32 %v786_v9, %v653_v8  ;;  %v785_v13 = vld [vmem:[#allocation2 + $0xa4] sm:$0xf]  ;;  %v655_v14 = vld [vmem:[#allocation2 + $0xa8] sm:$0xf0]  ;;  %v594_v15 = vor.u32 %v769_v10, %v591_v12  ;;  %v581_v17 = vld [vmem:[#allocation2 + $0x10] sm:$0xf] }
  0x1f   :  { %334 = vmatpush.bf16.msra.mxu3 %v670_v54  ;;  %v658_v16 = vor.u32 %v785_v13, %v655_v14  ;;  %v768_v18 = vld [vmem:[#allocation2 + $0x14] sm:$0xf0]  ;;  %v645_v19 = vld [vmem:[#allocation2 + $0x90] sm:$0xf]  ;;  %v767_v22 = vld [vmem:[#allocation2 + $0x14] sm:$0xf] }
  0x20   :  { %348 = vmatpush.bf16.msrb.mxu0 %v610_v55  ;;  %362 = vmatpush.bf16.msrb.mxu1 %v674_v56  ;;  %v582_v20 = vor.u32 %v768_v18, %v581_v17  ;;  %v784_v21 = vld [vmem:[#allocation2 + $0x94] sm:$0xf0]  ;;  %v583_v23 = vld [vmem:[#allocation2 + $0x18] sm:$0xf0]  ;;  %v783_v26 = vld [vmem:[#allocation2 + $0x94] sm:$0xf] }
  0x21   :  { %v646_v24 = vor.u32 %v784_v21, %v645_v19  ;;  %v586_v25 = vor.u32 %v767_v22, %v583_v23  ;;  %v647_v27 = vld [vmem:[#allocation2 + $0x98] sm:$0xf0]  ;;  %v573_v29 = vld [vmem:[#allocation2] sm:$0xf]  ;;  %v766_v30 = vld [vmem:[#allocation2 + $0x4] sm:$0xf0] }
  0x22   :  { %321 = vmatpush.bf16.msra.mxu2 %v598_v60  ;;  %v650_v28 = vor.u32 %v783_v26, %v647_v27  ;;  %v637_v31 = vld [vmem:[#allocation2 + $0x80] sm:$0xf]  ;;  %v574_v32 = vor.u32 %v766_v30, %v573_v29  ;;  %v782_v33 = vld [vmem:[#allocation2 + $0x84] sm:$0xf0]  ;;  %v765_v34 = vld [vmem:[#allocation2 + $0x4] sm:$0xf] }
  0x23   :  { %335 = vmatpush.bf16.msra.mxu3 %v662_v0  ;;  %v575_v35 = vld [vmem:[#allocation2 + $0x8] sm:$0xf0]  ;;  %v638_v36 = vor.u32 %v782_v33, %v637_v31  ;;  %v781_v38 = vld [vmem:[#allocation2 + $0x84] sm:$0xf]  ;;  %v812_v41 = vld [vmem:[#allocation5 + $0x78] sm:$0xff] }
  0x24   :  { %349 = vmatpush.bf16.msrb.mxu0 %v602_v1  ;;  %363 = vmatpush.bf16.msrb.mxu1 %v666_v4  ;;  %v578_v37 = vor.u32 %v765_v34, %v575_v35  ;;  %v639_v39 = vld [vmem:[#allocation2 + $0x88] sm:$0xf0]  ;;  %v804_v42 = vld [vmem:[#allocation5 + $0x38] sm:$0xff]  ;;  %v811_v43 = vld [vmem:[#allocation5 + $0x70] sm:$0xff] }
  0x25   :  { %v642_v40 = vor.u32 %v781_v38, %v639_v39  ;;  %v803_v44 = vld [vmem:[#allocation5 + $0x30] sm:$0xff]  ;;  %v810_v45 = vld [vmem:[#allocation5 + $0x68] sm:$0xff]  ;;  %v809_v46 = vld [vmem:[#allocation5 + $0x60] sm:$0xff] }
  0x26   :  { %322 = vmatpush.bf16.msra.mxu2 %v590_v7  ;;  %v65_v47 = vld [vmem:[%s992_s2] sm:$0x3]  ;;  %v802_v0 = vld [vmem:[#allocation5 + $0x28] sm:$0xff]  ;;  %v808_v1 = vld [vmem:[#allocation5 + $0x58] sm:$0xff] }
  0x27   :  { %336 = vmatpush.bf16.msra.mxu3 %v654_v11  ;;  %v67_v50 = vperm.slane %v65_v47, 0  ;;  %v68_v51 = vperm.slane %v65_v47, 1  ;;  %v801_v2 = vld [vmem:[#allocation5 + $0x20] sm:$0xff]  ;;  %v807_v3 = vld [vmem:[#allocation5 + $0x50] sm:$0xff]  ;;  %v800_v4 = vld [vmem:[#allocation5 + $0x18] sm:$0xff] }
  0x28   :  { %350 = vmatpush.bf16.msrb.mxu0 %v594_v15  ;;  %364 = vmatpush.bf16.msrb.mxu1 %v658_v16  ;;  %v806_v5 = vld [vmem:[#allocation5 + $0x48] sm:$0xff]  ;;  %v799_v6 = vld [vmem:[#allocation5 + $0x10] sm:$0xff]  ;;  %v805_v7 = vld [vmem:[#allocation5 + $0x40] sm:$0xff] }
  0x29   :  { %v798_v8 = vld [vmem:[#allocation5 + $0x8] sm:$0xff]  ;;  %v797_v9 = vld [vmem:[#allocation5] sm:$0xff] }
  0x2a   :  { %323 = vmatpush.bf16.msra.mxu2 %v582_v20  ;;  %v151_v10 = vld [vmem:[%s994_s4] sm:$0x3] }
  0x2b   :  { %337 = vmatpush.bf16.msra.mxu3 %v646_v24  ;;  %v154_v12 = vperm.slane %v151_v10, 1  ;;  %v153_v16 = vperm.slane %v151_v10, 0  ;;  %v820_v35 = vld [vmem:[%s996_s6] ss:$0 sm:$0xff] }
  0x2c   :  { %351 = vmatpush.bf16.msrb.mxu0 %v586_v25  ;;  %365 = vmatpush.bf16.msrb.mxu1 %v650_v28 }
  0x2e   :  { %324 = vmatpush.bf16.msra.mxu2 %v574_v32 }
  0x2f   :  { %338 = vmatpush.bf16.msra.mxu3 %v638_v36 }
  0x30   :  { %352 = vmatpush.bf16.msrb.mxu0 %v578_v37  ;;  %366 = vmatpush.bf16.msrb.mxu1 %v642_v40 }
  0x32   :  { %511 = vmatpush.bf16.msrb.mxu2 %v804_v42 }
  0x33   :  { %525 = vmatpush.bf16.msrb.mxu3 %v812_v41 }
  0x36   :  { %512 = vmatpush.bf16.msrb.mxu2 %v803_v44 }
  0x37   :  { %526 = vmatpush.bf16.msrb.mxu3 %v811_v43 }
  0x3a   :  { %513 = vmatpush.bf16.msrb.mxu2 %v802_v0 }
  0x3b   :  { %527 = vmatpush.bf16.msrb.mxu3 %v810_v45 }
  0x3e   :  { %514 = vmatpush.bf16.msrb.mxu2 %v801_v2 }
  0x3f   :  { %528 = vmatpush.bf16.msrb.mxu3 %v809_v46 }
  0x42   :  { %515 = vmatpush.bf16.msrb.mxu2 %v800_v4 }
  0x43   :  { %529 = vmatpush.bf16.msrb.mxu3 %v808_v1 }
  0x46   :  { %516 = vmatpush.bf16.msrb.mxu2 %v799_v6 }
  0x47   :  { %530 = vmatpush.bf16.msrb.mxu3 %v807_v3 }
  0x4a   :  { %517 = vmatpush.bf16.msrb.mxu2 %v798_v8 }
  0x4b   :  { %531 = vmatpush.bf16.msrb.mxu3 %v806_v5 }
  0x4e   :  { %518 = vmatpush.bf16.msrb.mxu2 %v797_v9 }
  0x4f   :  { %532 = vmatpush.bf16.msrb.mxu3 %v805_v7 }
  0x8f   :  { %v94_v48 = vpop.f32.mrf.mxu0 }
  0x90   :  { %v108_v49 = vpop.f32.mrf.mxu1  ;;  %v95_v52 = vadd.f32 %v94_v48, %v67_v50 }
  0x91   :  { %v109_v53 = vadd.f32 %v108_v49, %v68_v51 }
  0x92   :  { %v113_v58 = vmax.f32 %v95_v52, 0.0 }
  0x93   :  { %v114_v60 = vmax.f32 %v109_v53, 0.0 }
  0x97   :  { %v96_v54 = vpop.f32.mrf.mxu0 }
  0x98   :  { %v97_v55 = vadd.f32 %v96_v54, %v67_v50  ;;  %v110_v56 = vpop.f32.mrf.mxu1 }
  0x99   :  { %v111_v57 = vadd.f32 %v110_v56, %v68_v51 }
  0x9a   :  { %v115_v59 = vmax.f32 %v97_v55, 0.0 }
  0x9b   :  { %v116_v61 = vmax.f32 %v111_v57, 0.0 }
  0x9c   :  { %v117_v62 = vpack.c.bf16 %v115_v59, %v113_v58 }
  0x9d   :  { %v118_v63 = vpack.c.bf16 %v116_v61, %v114_v60 }
  0x9e   :  { %325 = vmatmul.bf16.vlgmr.msra.gmra.mxu2 %v117_v62  ;;  %353 = vmatmul.bf16.vlgmr.msrb.gmra.mxu0 %v117_v62 }
  0x9f   :  { %339 = vmatmul.bf16.vlgmr.msra.gmra.mxu3 %v118_v63  ;;  %367 = vmatmul.bf16.vlgmr.msrb.gmra.mxu1 %v118_v63 }
 0x11b   :  { %v354_v11 = vpop.f32.mrf.mxu0 }
 0x11c   :  { %v368_v13 = vpop.f32.mrf.mxu1  ;;  %v355_v14 = vadd.f32 %v354_v11, %v154_v12 }
 0x11e   :  { %v369_v19 = vadd.f32 %v368_v13, %v355_v14 }
 0x120   :  { %v374_v24 = vmax.f32 %v369_v19, 0.0 }
 0x121   :  { %v326_v15 = vpop.f32.mrf.mxu2 }
 0x122   :  { %v340_v17 = vpop.f32.mrf.mxu3  ;;  %v327_v22 = vadd.f32 %v326_v15, %v153_v16 }
 0x123   :  { %v356_v18 = vpop.f32.mrf.mxu0 }
 0x124   :  { %v357_v20 = vadd.f32 %v356_v18, %v154_v12  ;;  %v370_v21 = vpop.f32.mrf.mxu1  ;;  %v341_v27 = vadd.f32 %v340_v17, %v327_v22 }
 0x126   :  { %v371_v23 = vadd.f32 %v370_v21, %v357_v20  ;;  %v373_v32 = vmax.f32 %v341_v27, 0.0 }
 0x128   :  { %v376_v25 = vmax.f32 %v371_v23, 0.0 }
 0x129   :  { %v328_v26 = vpop.f32.mrf.mxu2 }
 0x12a   :  { %v378_v28 = vpack.c.bf16 %v376_v25, %v374_v24  ;;  %v329_v29 = vadd.f32 %v328_v26, %v153_v16  ;;  %v342_v30 = vpop.f32.mrf.mxu3 }
 0x12c   :  { %v343_v31 = vadd.f32 %v342_v30, %v329_v29  ;;  %533 = vmatmul.bf16.vlgmr.msrb.gmra.mxu3 %v378_v28 }
 0x12e   :  { %v375_v33 = vmax.f32 %v343_v31, 0.0 }
 0x130   :  { %v377_v34 = vpack.c.bf16 %v375_v33, %v373_v32 }
 0x132   :  { %519 = vmatmul.bf16.vlgmr.msrb.gmra.mxu2 %v377_v34 }
 0x1af   :  { %v534_v36 = vpop.f32.mrf.mxu3 }
 0x1b5   :  { %v520_v37 = vpop.f32.mrf.mxu2 }
 0x1b6   :  { %v521_v38 = vadd.f32 %v820_v35, %v520_v37 }
 0x1b7   :  { %v536_v42 = vpop.f32.mrf.mxu3 }
 0x1b8   :  { %v535_v39 = vadd.f32 %v534_v36, %v521_v38 }
 0x1ba   :  { %539 = vst [vmem:[#allocation7] sm:$0xff] %v535_v39 }
 0x1bd   :  { %v522_v40 = vpop.f32.mrf.mxu2 }
 0x1be   :  { %v523_v41 = vadd.f32 %v820_v35, %v522_v40 }
 0x1c0   :  { %v537_v43 = vadd.f32 %v536_v42, %v523_v41 }
 0x1c2   :  { %540 = vst [vmem:[#allocation7 + $0x8] sm:$0xff] %v537_v43 }
 0x1c3   :  { %553 = dma.vmem_to_hbm [thread:$0]  %s546_s28, 256, %s548_s8, [#allocation4], %s900_s9, %s900_s9, %s901_s10  }
 0x1c4   :  { %897 = dma.done.wait [#allocation4], 256  }
 0x1c5   :  { %898 = vsyncadd [#allocation4], 4294967040 }
 0x1c6   :  { %558 = vsyncpa [#allocation3], 1 }
 0x1c7   :  { %559 = vsyncpa [#allocation6], 1 }
 0x1c8   :  { %560 = vsyncpa [#allocation4], 1 }

</bundles_post_ra>
